<compile_context>
chip_gen: v5e
topology: v5e:2x2
jax: 0.10.0
libtpu: 0.0.40
codegen_flags: <defaults>
</compile_context>

<pallas_src>
import jax
import jax.numpy as jnp
from jax.experimental import pallas as pl
from jax.experimental.pallas import tpu as pltpu


def _mha_kernel(x_ref, wqkv_ref, bqkv_ref, wp_ref, bp_ref,
                out_ref, attn_ref, q_s, k_s, v_s):
    """One grid step = (one batch tile) x (one query tile)."""
    bt, h, n, d = q_s.shape          # batch tile, heads, seq (keys), head_dim
    c = h * d
    g = bt * h
    qt = out_ref.shape[1]            # query-tile length
    j = pl.program_id(1)             # query-tile index (inner grid axis)

    # ---- fused QKV projection: one bf16 MXU matmul, once per batch tile -----
    @pl.when(j == 0)
    def _project():
        qkv = (jnp.dot(x_ref[...], wqkv_ref[...],
                       preferred_element_type=jnp.float32)
               + bqkv_ref[...])                               # (bt*n, 3c) f32
        qkv = qkv.reshape(bt, n, 3 * c).astype(jnp.bfloat16)
        # Head split absorbed into the scratch writes: static lane slices of
        # the fused projection + leading-dim indexed stores (no transposes).
        for hh in range(h):                                   # static, unrolled
            q_s[:, hh] = qkv[:, :, hh * d:(hh + 1) * d]       # scale pre-folded
            k_s[:, hh] = qkv[:, :, c + hh * d:c + (hh + 1) * d]
            v_s[:, hh] = qkv[:, :, 2 * c + hh * d:2 * c + (hh + 1) * d]

    # ---- head-batched attention for this query tile --------------------------
    # keys stay untiled, so the row softmax is exact in a single pass.
    row0 = pl.multiple_of(j * qt, qt)
    q = q_s[:, :, pl.ds(row0, qt), :].reshape(g, qt, d)       # leading merge only
    k = k_s[...].reshape(g, n, d)
    v = v_s[...].reshape(g, n, d)

    s = jnp.einsum('gqd,gkd->gqk', q, k,
                   preferred_element_type=jnp.float32)        # (g, qt, n)
    s = s - jnp.max(s, axis=-1, keepdims=True)
    e = jnp.exp(s)
    p = e * pl.reciprocal(jnp.sum(e, axis=-1, keepdims=True), approx=True)

    # one probability store per step in the (bt, h, qt, m) block layout
    # (lane-dense whenever m % 128 == 0; no in-kernel relayout needed).
    attn_ref[...] = p.reshape(bt, h, qt, n).astype(attn_ref.dtype)

    o = jnp.einsum('gqk,gkd->gqd', p.astype(jnp.bfloat16), v,
                   preferred_element_type=jnp.float32)        # (g, qt, d)
    # merge heads back to token-major columns with a minor-axis concat
    o = o.reshape(bt, h, qt, d)
    o_tok = jnp.concatenate([o[:, hh] for hh in range(h)], axis=-1)  # (bt, qt, c)

    out = (jnp.dot(o_tok.reshape(bt * qt, c).astype(jnp.bfloat16), wp_ref[...],
                   preferred_element_type=jnp.float32)
           + bp_ref[...])
    out_ref[...] = out.reshape(bt, qt, c).astype(out_ref.dtype)


def _choose_tiles(b, n, c, num_heads, attn_itemsize):
    """Pick (batch_tile, query_tile, vmem_limit) under the VMEM budget.

    Preference order: fill the MXU M dim of the projections (largest tiles),
    keep every BlockSpec trailing-dim legal ((8,128)-aligned or full), and only
    then split the batch for the second v7x TensorCore.
    """
    try:
        vmem_cap = int(pltpu.get_tpu_info().vmem_capacity_bytes)
    except Exception:                       # conservative fallback: v7x per-core
        vmem_cap = 64 * 1024 * 1024
    vmem_limit = int(min(vmem_cap * 3 // 4, 96 * 1024 * 1024))
    budget = vmem_limit // 2                # headroom: dbl-buffering, padding

    h, d, m = num_heads, c // num_heads, n
    pad = lambda v: -(-v // 128) * 128
    c_pad, m_pad, d_pad = pad(c), pad(m), pad(d)

    def step_bytes(bt, qt):
        weights = 2 * 2 * (3 * c * c_pad + c * c_pad) + 2 * 4 * 4 * c_pad
        x_blk = 2 * 2 * bt * n * c_pad
        scratch = 3 * 2 * bt * h * n * d_pad
        attn_blk = 2 * bt * h * qt * m_pad * attn_itemsize
        out_blk = 2 * 4 * bt * qt * c_pad
        interm = 4 * (3 * bt * h * qt * m_pad + 3 * bt * n * c_pad)
        return weights + x_blk + scratch + attn_blk + out_blk + interm

    divs = lambda v: [k for k in range(v, 0, -1) if v % k == 0]

    qt_cands = [v for v in divs(n) if v == n or v % 8 == 0] or [n]
    qt = next((v for v in qt_cands if step_bytes(1, v) <= budget), qt_cands[-1])

    bt_cands = [v for v in divs(b) if v == b or (v * n) % 8 == 0] or [b]
    bt = next((v for v in bt_cands if step_bytes(v, qt) <= budget), bt_cands[-1])

    # give the v7x second TensorCore a grid step only if it keeps the QKV
    # projection's M dim (bt*n rows) filled and the x block (8-row) legal.
    if bt == b and b % 2 == 0 and (b // 2) * n >= 256 and ((b // 2) * n) % 8 == 0:
        bt = b // 2
    return bt, qt, vmem_limit


def multi_head_attention(x, params, num_heads, *, y=None, mask=None,
                         b_tile=None, q_tile=None, attn_dtype=jnp.float32):
    """Self-attention forward matching MultiHeadAttention.forward(x).

    Returns (out, attention) in the PyTorch layouts: out (b, n, c), attention
    (b, n, m, h).  Linear weights are stored pre-transposed as (in, out).
    Set attn_dtype=jnp.bfloat16 to halve the attention-probability writeback.
    """
    # TODO(synk): optional `mask` and cross-attention `y` are not implemented
    # (common call path is self-attention with mask=None); the module's dropout
    # is declared but never applied in its forward, so it is omitted as well.
    if y is not None or mask is not None:
        raise NotImplementedError("mask / cross-attention are not implemented")

    wq, bq, wkv, bkv, wp, bp = params
    b, n, c = x.shape
    h = num_heads
    assert c % h == 0
    d = c // h
    m = n
    scale = d ** (-0.5)

    # ---- parameter prep (wrapper-side, off the hot path) ---------------------
    # fuse Q|K|V into one weight and fold the softmax scale into the Q columns.
    wk, wv = wkv[:, :c], wkv[:, c:]
    bk, bv = bkv[:, :c], bkv[:, c:]
    wqkv = jnp.concatenate([wq * scale, wk, wv], axis=1).astype(jnp.bfloat16)
    bqkv = jnp.concatenate([bq * scale, bk, bv], axis=1).astype(jnp.float32)
    wp_lo = wp.astype(jnp.bfloat16)
    bp_f = bp.astype(jnp.float32)
    x_tok = x.reshape(b * n, c).astype(jnp.bfloat16)   # token-major bf16 slab

    bt_auto, qt_auto, vmem_limit = _choose_tiles(
        b, n, c, h, jnp.dtype(attn_dtype).itemsize)
    bt = b_tile if b_tile is not None else bt_auto
    qt = q_tile if q_tile is not None else qt_auto
    assert b % bt == 0 and n % qt == 0
    grid = (b // bt, n // qt)

    out, attn_hm = pl.pallas_call(
        _mha_kernel,
        out_shape=(
            jax.ShapeDtypeStruct((b, n, c), jnp.float32),
            jax.ShapeDtypeStruct((b, h, n, m), attn_dtype),
        ),
        grid=grid,
        in_specs=[
            pl.BlockSpec((bt * n, c), lambda i, j: (i, 0)),    # x, revisited over j
            pl.BlockSpec((c, 3 * c), lambda i, j: (0, 0)),     # fused Wqkv (bf16)
            pl.BlockSpec((1, 3 * c), lambda i, j: (0, 0)),     # fused bqkv (f32)
            pl.BlockSpec((c, c), lambda i, j: (0, 0)),         # Wp (bf16)
            pl.BlockSpec((1, c), lambda i, j: (0, 0)),         # bp (f32)
        ],
        out_specs=(
            pl.BlockSpec((bt, qt, c), lambda i, j: (i, j, 0)),
            pl.BlockSpec((bt, h, qt, m), lambda i, j: (i, 0, j, 0)),
        ),
        scratch_shapes=[
            pltpu.VMEM((bt, h, n, d), jnp.bfloat16),   # q (head-major, scale folded)
            pltpu.VMEM((bt, h, n, d), jnp.bfloat16),   # k
            pltpu.VMEM((bt, h, n, d), jnp.bfloat16),   # v
        ],
        compiler_params=pltpu.CompilerParams(
            dimension_semantics=("parallel", "arbitrary"),
            vmem_limit_bytes=vmem_limit),
    )(x_tok, wqkv, bqkv, wp_lo, bp_f)

    # torch layout (b, n, m, h).  NOTE: this is a full extra relayout pass over
    # the h*n^2 tensor in XLA; consumers that accept (b, h, n, m) should take
    # attn_hm directly and skip it.
    attn = attn_hm.transpose(0, 2, 3, 1)
    return out, attn


def _reference_mha(x, params, num_heads):
    """Pure-JAX f32 reference of the PyTorch forward (self-attention path)."""
    wq, bq, wkv, bkv, wp, bp = params
    b, n, c = x.shape
    d = c // num_heads
    scale = d ** (-0.5)
    q = (x @ wq + bq).reshape(b, n, num_heads, d)
    kv = (x @ wkv + bkv).reshape(b, n, 2, num_heads, d)
    k, v = kv[:, :, 0], kv[:, :, 1]
    attn = jnp.einsum('bnhd,bmhd->bnmh', q, k) * scale
    attn = jax.nn.softmax(attn, axis=2)
    out = jnp.einsum('bnmh,bmhd->bnhd', attn, v).reshape(b, n, c)
    out = out @ wp + bp
    return out, attn


if __name__ == "__main__":
    # small shapes consistent with the module: batch=2, seq=8, dim_self=32, heads=4
    b, n, c = 2, 8, 32
    num_heads = 4

    key = jax.random.PRNGKey(0)
    kx, k1, k2, k3, k4, k5, k6 = jax.random.split(key, 7)

    x = jax.random.normal(kx, (b, n, c), dtype=jnp.float32)

    # deterministic synthetic parameters (Linear weights stored as (in, out))
    wq = 0.02 * jax.random.normal(k1, (c, c), dtype=jnp.float32)
    bq = 0.02 * jax.random.normal(k2, (1, c), dtype=jnp.float32)
    wkv = 0.02 * jax.random.normal(k3, (c, 2 * c), dtype=jnp.float32)
    bkv = 0.02 * jax.random.normal(k4, (1, 2 * c), dtype=jnp.float32)
    wp = 0.02 * jax.random.normal(k5, (c, c), dtype=jnp.float32)
    bp = 0.02 * jax.random.normal(k6, (1, c), dtype=jnp.float32)
    params = (wq, bq, wkv, bkv, wp, bp)

    out, attn = multi_head_attention(x, params, num_heads)
    out = jax.block_until_ready(out)
    attn = jax.block_until_ready(attn)

    ref_out, ref_attn = _reference_mha(x, params, num_heads)
    assert out.shape == (b, n, c)
    assert attn.shape == (b, n, n, num_heads)
    # bf16 matmul operands + EUP approximate reciprocal -> compare against the
    # f32 reference with a slightly relaxed (but still tight) tolerance.
    assert jnp.allclose(out, ref_out, atol=2e-3, rtol=2e-2)
    assert jnp.allclose(attn, ref_attn, atol=2e-3, rtol=2e-2)

    print("KERNEL_OK")
</pallas_src>

<mosaic_0001>
module attributes {stable_mosaic.version = 11 : i64} {
  func.func @_mha_kernel(%arg0: i32, %arg1: i32, %arg2: memref<16x32xbf16, #tpu.memory_space<vmem>>, %arg3: memref<32x96xbf16, #tpu.memory_space<vmem>>, %arg4: memref<1x96xf32, #tpu.memory_space<vmem>>, %arg5: memref<32x32xbf16, #tpu.memory_space<vmem>>, %arg6: memref<1x32xf32, #tpu.memory_space<vmem>>, %arg7: memref<2x8x32xf32, #tpu.memory_space<vmem>>, %arg8: memref<2x4x8x8xf32, #tpu.memory_space<vmem>>, %arg9: memref<2x4x8x8xbf16, #tpu.memory_space<vmem>>, %arg10: memref<2x4x8x8xbf16, #tpu.memory_space<vmem>>, %arg11: memref<2x4x8x8xbf16, #tpu.memory_space<vmem>>) attributes {dimension_semantics = [#tpu.dimension_semantics<parallel>, #tpu.dimension_semantics<arbitrary>], iteration_bounds = array<i64: 1, 1>, scalar_prefetch = 0 : i64, scratch_operands = 3 : i64, tpu.core_type = #tpu.core_type<tc>, window_params = [{transform_indices = @transform_0, window_bounds = array<i64: 16, 32>}, {pipeline_mode = #tpu.pipeline_mode<synchronous>, transform_indices = @transform_1, window_bounds = array<i64: 32, 96>}, {pipeline_mode = #tpu.pipeline_mode<synchronous>, transform_indices = @transform_2, window_bounds = array<i64: 1, 96>}, {pipeline_mode = #tpu.pipeline_mode<synchronous>, transform_indices = @transform_3, window_bounds = array<i64: 32, 32>}, {pipeline_mode = #tpu.pipeline_mode<synchronous>, transform_indices = @transform_4, window_bounds = array<i64: 1, 32>}, {transform_indices = @transform_5, window_bounds = array<i64: 2, 8, 32>}, {transform_indices = @transform_6, window_bounds = array<i64: 2, 4, 8, 8>}]} {
    %c0_i32 = arith.constant 0 : i32
    %0 = arith.cmpi eq, %arg1, %c0_i32 : i32
    %1 = arith.extui %0 : i1 to i32
    %c0_i32_0 = arith.constant 0 : i32
    %2 = arith.cmpi ne, %1, %c0_i32_0 : i32
    scf.if %2 {
      %c0_26 = arith.constant 0 : index
      %c0_27 = arith.constant 0 : index
      %46 = vector.load %arg2[%c0_26, %c0_27] : memref<16x32xbf16, #tpu.memory_space<vmem>>, vector<16x32xbf16>
      %c0_28 = arith.constant 0 : index
      %c0_29 = arith.constant 0 : index
      %47 = vector.load %arg3[%c0_28, %c0_29] : memref<32x96xbf16, #tpu.memory_space<vmem>>, vector<32x96xbf16>
      %cst_30 = arith.constant dense<0.000000e+00> : vector<16x96xf32>
      %48 = tpu.matmul %46, %47, %cst_30 {dimension_numbers = #tpu.dot_dimension_numbers<[1], [0], [0], [1], [0, 0, 1, 1], [], []>} : vector<16x32xbf16>, vector<32x96xbf16>, vector<16x96xf32> -> vector<16x96xf32>
      %c0_31 = arith.constant 0 : index
      %c0_32 = arith.constant 0 : index
      %49 = vector.load %arg4[%c0_31, %c0_32] : memref<1x96xf32, #tpu.memory_space<vmem>>, vector<1x96xf32>
      %50 = vector.broadcast %49 : vector<1x96xf32> to vector<16x96xf32>
      %51 = arith.addf %48, %50 : vector<16x96xf32>
      %52 = vector.shape_cast %51 : vector<16x96xf32> to vector<2x8x96xf32>
      %53 = arith.truncf %52 : vector<2x8x96xf32> to vector<2x8x96xbf16>
      %54 = vector.extract_strided_slice %53 {offsets = [0, 0, 0], sizes = [2, 8, 8], strides = [1, 1, 1]} : vector<2x8x96xbf16> to vector<2x8x8xbf16>
      %c0_33 = arith.constant 0 : index
      %c0_34 = arith.constant 0 : index
      %c0_35 = arith.constant 0 : index
      %c0_36 = arith.constant 0 : index
      %55 = vector.load %arg9[%c0_33, %c0_34, %c0_35, %c0_36] : memref<2x4x8x8xbf16, #tpu.memory_space<vmem>>, vector<2x1x8x8xbf16>
      %56 = vector.shape_cast %55 : vector<2x1x8x8xbf16> to vector<2x8x8xbf16>
      %57 = vector.shape_cast %54 : vector<2x8x8xbf16> to vector<2x1x8x8xbf16>
      tpu.vector_store %arg9[%c0_33, %c0_34, %c0_35, %c0_36], %57 {strides = array<i32>} : memref<2x4x8x8xbf16, #tpu.memory_space<vmem>>, vector<2x1x8x8xbf16>,
      %58 = vector.extract_strided_slice %53 {offsets = [0, 0, 32], sizes = [2, 8, 8], strides = [1, 1, 1]} : vector<2x8x96xbf16> to vector<2x8x8xbf16>
      %c0_37 = arith.constant 0 : index
      %c0_38 = arith.constant 0 : index
      %c0_39 = arith.constant 0 : index
      %c0_40 = arith.constant 0 : index
      %59 = vector.load %arg10[%c0_37, %c0_38, %c0_39, %c0_40] : memref<2x4x8x8xbf16, #tpu.memory_space<vmem>>, vector<2x1x8x8xbf16>
      %60 = vector.shape_cast %59 : vector<2x1x8x8xbf16> to vector<2x8x8xbf16>
      %61 = vector.shape_cast %58 : vector<2x8x8xbf16> to vector<2x1x8x8xbf16>
      tpu.vector_store %arg10[%c0_37, %c0_38, %c0_39, %c0_40], %61 {strides = array<i32>} : memref<2x4x8x8xbf16, #tpu.memory_space<vmem>>, vector<2x1x8x8xbf16>,
      %62 = vector.extract_strided_slice %53 {offsets = [0, 0, 64], sizes = [2, 8, 8], strides = [1, 1, 1]} : vector<2x8x96xbf16> to vector<2x8x8xbf16>
      %c0_41 = arith.constant 0 : index
      %c0_42 = arith.constant 0 : index
      %c0_43 = arith.constant 0 : index
      %c0_44 = arith.constant 0 : index
      %63 = vector.load %arg11[%c0_41, %c0_42, %c0_43, %c0_44] : memref<2x4x8x8xbf16, #tpu.memory_space<vmem>>, vector<2x1x8x8xbf16>
      %64 = vector.shape_cast %63 : vector<2x1x8x8xbf16> to vector<2x8x8xbf16>
      %65 = vector.shape_cast %62 : vector<2x8x8xbf16> to vector<2x1x8x8xbf16>
      tpu.vector_store %arg11[%c0_41, %c0_42, %c0_43, %c0_44], %65 {strides = array<i32>} : memref<2x4x8x8xbf16, #tpu.memory_space<vmem>>, vector<2x1x8x8xbf16>,
      %66 = vector.extract_strided_slice %53 {offsets = [0, 0, 8], sizes = [2, 8, 8], strides = [1, 1, 1]} : vector<2x8x96xbf16> to vector<2x8x8xbf16>
      %c0_45 = arith.constant 0 : index
      %c1 = arith.constant 1 : index
      %c0_46 = arith.constant 0 : index
      %c0_47 = arith.constant 0 : index
      %67 = vector.load %arg9[%c0_45, %c1, %c0_46, %c0_47] : memref<2x4x8x8xbf16, #tpu.memory_space<vmem>>, vector<2x1x8x8xbf16>
      %68 = vector.shape_cast %67 : vector<2x1x8x8xbf16> to vector<2x8x8xbf16>
      %69 = vector.shape_cast %66 : vector<2x8x8xbf16> to vector<2x1x8x8xbf16>
      tpu.vector_store %arg9[%c0_45, %c1, %c0_46, %c0_47], %69 {strides = array<i32>} : memref<2x4x8x8xbf16, #tpu.memory_space<vmem>>, vector<2x1x8x8xbf16>,
      %70 = vector.extract_strided_slice %53 {offsets = [0, 0, 40], sizes = [2, 8, 8], strides = [1, 1, 1]} : vector<2x8x96xbf16> to vector<2x8x8xbf16>
      %c0_48 = arith.constant 0 : index
      %c1_49 = arith.constant 1 : index
      %c0_50 = arith.constant 0 : index
      %c0_51 = arith.constant 0 : index
      %71 = vector.load %arg10[%c0_48, %c1_49, %c0_50, %c0_51] : memref<2x4x8x8xbf16, #tpu.memory_space<vmem>>, vector<2x1x8x8xbf16>
      %72 = vector.shape_cast %71 : vector<2x1x8x8xbf16> to vector<2x8x8xbf16>
      %73 = vector.shape_cast %70 : vector<2x8x8xbf16> to vector<2x1x8x8xbf16>
      tpu.vector_store %arg10[%c0_48, %c1_49, %c0_50, %c0_51], %73 {strides = array<i32>} : memref<2x4x8x8xbf16, #tpu.memory_space<vmem>>, vector<2x1x8x8xbf16>,
      %74 = vector.extract_strided_slice %53 {offsets = [0, 0, 72], sizes = [2, 8, 8], strides = [1, 1, 1]} : vector<2x8x96xbf16> to vector<2x8x8xbf16>
      %c0_52 = arith.constant 0 : index
      %c1_53 = arith.constant 1 : index
      %c0_54 = arith.constant 0 : index
      %c0_55 = arith.constant 0 : index
      %75 = vector.load %arg11[%c0_52, %c1_53, %c0_54, %c0_55] : memref<2x4x8x8xbf16, #tpu.memory_space<vmem>>, vector<2x1x8x8xbf16>
      %76 = vector.shape_cast %75 : vector<2x1x8x8xbf16> to vector<2x8x8xbf16>
      %77 = vector.shape_cast %74 : vector<2x8x8xbf16> to vector<2x1x8x8xbf16>
      tpu.vector_store %arg11[%c0_52, %c1_53, %c0_54, %c0_55], %77 {strides = array<i32>} : memref<2x4x8x8xbf16, #tpu.memory_space<vmem>>, vector<2x1x8x8xbf16>,
      %78 = vector.extract_strided_slice %53 {offsets = [0, 0, 16], sizes = [2, 8, 8], strides = [1, 1, 1]} : vector<2x8x96xbf16> to vector<2x8x8xbf16>
      %c0_56 = arith.constant 0 : index
      %c2 = arith.constant 2 : index
      %c0_57 = arith.constant 0 : index
      %c0_58 = arith.constant 0 : index
      %79 = vector.load %arg9[%c0_56, %c2, %c0_57, %c0_58] : memref<2x4x8x8xbf16, #tpu.memory_space<vmem>>, vector<2x1x8x8xbf16>
      %80 = vector.shape_cast %79 : vector<2x1x8x8xbf16> to vector<2x8x8xbf16>
      %81 = vector.shape_cast %78 : vector<2x8x8xbf16> to vector<2x1x8x8xbf16>
      tpu.vector_store %arg9[%c0_56, %c2, %c0_57, %c0_58], %81 {strides = array<i32>} : memref<2x4x8x8xbf16, #tpu.memory_space<vmem>>, vector<2x1x8x8xbf16>,
      %82 = vector.extract_strided_slice %53 {offsets = [0, 0, 48], sizes = [2, 8, 8], strides = [1, 1, 1]} : vector<2x8x96xbf16> to vector<2x8x8xbf16>
      %c0_59 = arith.constant 0 : index
      %c2_60 = arith.constant 2 : index
      %c0_61 = arith.constant 0 : index
      %c0_62 = arith.constant 0 : index
      %83 = vector.load %arg10[%c0_59, %c2_60, %c0_61, %c0_62] : memref<2x4x8x8xbf16, #tpu.memory_space<vmem>>, vector<2x1x8x8xbf16>
      %84 = vector.shape_cast %83 : vector<2x1x8x8xbf16> to vector<2x8x8xbf16>
      %85 = vector.shape_cast %82 : vector<2x8x8xbf16> to vector<2x1x8x8xbf16>
      tpu.vector_store %arg10[%c0_59, %c2_60, %c0_61, %c0_62], %85 {strides = array<i32>} : memref<2x4x8x8xbf16, #tpu.memory_space<vmem>>, vector<2x1x8x8xbf16>,
      %86 = vector.extract_strided_slice %53 {offsets = [0, 0, 80], sizes = [2, 8, 8], strides = [1, 1, 1]} : vector<2x8x96xbf16> to vector<2x8x8xbf16>
      %c0_63 = arith.constant 0 : index
      %c2_64 = arith.constant 2 : index
      %c0_65 = arith.constant 0 : index
      %c0_66 = arith.constant 0 : index
      %87 = vector.load %arg11[%c0_63, %c2_64, %c0_65, %c0_66] : memref<2x4x8x8xbf16, #tpu.memory_space<vmem>>, vector<2x1x8x8xbf16>
      %88 = vector.shape_cast %87 : vector<2x1x8x8xbf16> to vector<2x8x8xbf16>
      %89 = vector.shape_cast %86 : vector<2x8x8xbf16> to vector<2x1x8x8xbf16>
      tpu.vector_store %arg11[%c0_63, %c2_64, %c0_65, %c0_66], %89 {strides = array<i32>} : memref<2x4x8x8xbf16, #tpu.memory_space<vmem>>, vector<2x1x8x8xbf16>,
      %90 = vector.extract_strided_slice %53 {offsets = [0, 0, 24], sizes = [2, 8, 8], strides = [1, 1, 1]} : vector<2x8x96xbf16> to vector<2x8x8xbf16>
      %c0_67 = arith.constant 0 : index
      %c3 = arith.constant 3 : index
      %c0_68 = arith.constant 0 : index
      %c0_69 = arith.constant 0 : index
      %91 = vector.load %arg9[%c0_67, %c3, %c0_68, %c0_69] : memref<2x4x8x8xbf16, #tpu.memory_space<vmem>>, vector<2x1x8x8xbf16>
      %92 = vector.shape_cast %91 : vector<2x1x8x8xbf16> to vector<2x8x8xbf16>
      %93 = vector.shape_cast %90 : vector<2x8x8xbf16> to vector<2x1x8x8xbf16>
      tpu.vector_store %arg9[%c0_67, %c3, %c0_68, %c0_69], %93 {strides = array<i32>} : memref<2x4x8x8xbf16, #tpu.memory_space<vmem>>, vector<2x1x8x8xbf16>,
      %94 = vector.extract_strided_slice %53 {offsets = [0, 0, 56], sizes = [2, 8, 8], strides = [1, 1, 1]} : vector<2x8x96xbf16> to vector<2x8x8xbf16>
      %c0_70 = arith.constant 0 : index
      %c3_71 = arith.constant 3 : index
      %c0_72 = arith.constant 0 : index
      %c0_73 = arith.constant 0 : index
      %95 = vector.load %arg10[%c0_70, %c3_71, %c0_72, %c0_73] : memref<2x4x8x8xbf16, #tpu.memory_space<vmem>>, vector<2x1x8x8xbf16>
      %96 = vector.shape_cast %95 : vector<2x1x8x8xbf16> to vector<2x8x8xbf16>
      %97 = vector.shape_cast %94 : vector<2x8x8xbf16> to vector<2x1x8x8xbf16>
      tpu.vector_store %arg10[%c0_70, %c3_71, %c0_72, %c0_73], %97 {strides = array<i32>} : memref<2x4x8x8xbf16, #tpu.memory_space<vmem>>, vector<2x1x8x8xbf16>,
      %98 = vector.extract_strided_slice %53 {offsets = [0, 0, 88], sizes = [2, 8, 8], strides = [1, 1, 1]} : vector<2x8x96xbf16> to vector<2x8x8xbf16>
      %c0_74 = arith.constant 0 : index
      %c3_75 = arith.constant 3 : index
      %c0_76 = arith.constant 0 : index
      %c0_77 = arith.constant 0 : index
      %99 = vector.load %arg11[%c0_74, %c3_75, %c0_76, %c0_77] : memref<2x4x8x8xbf16, #tpu.memory_space<vmem>>, vector<2x1x8x8xbf16>
      %100 = vector.shape_cast %99 : vector<2x1x8x8xbf16> to vector<2x8x8xbf16>
      %101 = vector.shape_cast %98 : vector<2x8x8xbf16> to vector<2x1x8x8xbf16>
      tpu.vector_store %arg11[%c0_74, %c3_75, %c0_76, %c0_77], %101 {strides = array<i32>} : memref<2x4x8x8xbf16, #tpu.memory_space<vmem>>, vector<2x1x8x8xbf16>,
    } else {
    }
    %c8_i32 = arith.constant 8 : i32
    %3 = arith.muli %arg1, %c8_i32 : i32
    %4 = tpu.assume_multiple %3, 8 : i32
    %c0 = arith.constant 0 : index
    %c0_1 = arith.constant 0 : index
    %5 = arith.index_cast %4 : i32 to index
    %c0_2 = arith.constant 0 : index
    %6 = vector.load %arg9[%c0, %c0_1, %5, %c0_2] : memref<2x4x8x8xbf16, #tpu.memory_space<vmem>>, vector<2x4x8x8xbf16>
    %7 = vector.shape_cast %6 : vector<2x4x8x8xbf16> to vector<8x8x8xbf16>
    %c0_3 = arith.constant 0 : index
    %c0_4 = arith.constant 0 : index
    %c0_5 = arith.constant 0 : index
    %c0_6 = arith.constant 0 : index
    %8 = vector.load %arg10[%c0_3, %c0_4, %c0_5, %c0_6] : memref<2x4x8x8xbf16, #tpu.memory_space<vmem>>, vector<2x4x8x8xbf16>
    %9 = vector.shape_cast %8 : vector<2x4x8x8xbf16> to vector<8x8x8xbf16>
    %c0_7 = arith.constant 0 : index
    %c0_8 = arith.constant 0 : index
    %c0_9 = arith.constant 0 : index
    %c0_10 = arith.constant 0 : index
    %10 = vector.load %arg11[%c0_7, %c0_8, %c0_9, %c0_10] : memref<2x4x8x8xbf16, #tpu.memory_space<vmem>>, vector<2x4x8x8xbf16>
    %11 = vector.shape_cast %10 : vector<2x4x8x8xbf16> to vector<8x8x8xbf16>
    "tpu.trace_start"() <{level = 10 : i32, message = "gqd,gkd->gqk"}> : () -> ()
    %cst = arith.constant dense<0.000000e+00> : vector<8x8x8xf32>
    %12 = tpu.matmul %7, %9, %cst {dimension_numbers = #tpu.dot_dimension_numbers<[2], [2], [1], [1], [0, 0, 0, 1, 1, 1], [0], [0]>} : vector<8x8x8xbf16>, vector<8x8x8xbf16>, vector<8x8x8xf32> -> vector<8x8x8xf32>
    "tpu.trace_stop"() : () -> ()
    %cst_11 = arith.constant dense<0xFF800000> : vector<8x8xf32>
    %13 = vector.multi_reduction <maximumf>, %12, %cst_11 [2] : vector<8x8x8xf32> to vector<8x8xf32>
    %14 = vector.shape_cast %13 : vector<8x8xf32> to vector<8x8x1xf32>
    %15 = vector.broadcast %14 : vector<8x8x1xf32> to vector<8x8x8xf32>
    %16 = arith.subf %12, %15 : vector<8x8x8xf32>
    %17 = math.exp %16 : vector<8x8x8xf32>
    %cst_12 = arith.constant dense<0.000000e+00> : vector<8x8xf32>
    %18 = vector.multi_reduction <add>, %17, %cst_12 [2] : vector<8x8x8xf32> to vector<8x8xf32>
    %19 = vector.shape_cast %18 : vector<8x8xf32> to vector<8x8x1xf32>
    %20 = tpu.reciprocal %19 {approx = true} : vector<8x8x1xf32> -> vector<8x8x1xf32>
    %21 = vector.broadcast %20 : vector<8x8x1xf32> to vector<8x8x8xf32>
    %22 = arith.mulf %17, %21 : vector<8x8x8xf32>
    %23 = vector.shape_cast %22 : vector<8x8x8xf32> to vector<2x4x8x8xf32>
    %c0_13 = arith.constant 0 : index
    %c0_14 = arith.constant 0 : index
    %c0_15 = arith.constant 0 : index
    %c0_16 = arith.constant 0 : index
    %24 = vector.load %arg8[%c0_13, %c0_14, %c0_15, %c0_16] : memref<2x4x8x8xf32, #tpu.memory_space<vmem>>, vector<2x4x8x8xf32>
    tpu.vector_store %arg8[%c0_13, %c0_14, %c0_15, %c0_16], %23 {strides = array<i32>} : memref<2x4x8x8xf32, #tpu.memory_space<vmem>>, vector<2x4x8x8xf32>,
    %25 = arith.truncf %22 : vector<8x8x8xf32> to vector<8x8x8xbf16>
    "tpu.trace_start"() <{level = 10 : i32, message = "gqk,gkd->gqd"}> : () -> ()
    %cst_17 = arith.constant dense<0.000000e+00> : vector<8x8x8xf32>
    %26 = tpu.matmul %25, %11, %cst_17 {dimension_numbers = #tpu.dot_dimension_numbers<[2], [1], [1], [2], [0, 0, 0, 1, 1, 2], [0], [0]>} : vector<8x8x8xbf16>, vector<8x8x8xbf16>, vector<8x8x8xf32> -> vector<8x8x8xf32>
    "tpu.trace_stop"() : () -> ()
    %27 = vector.shape_cast %26 : vector<8x8x8xf32> to vector<2x4x8x8xf32>
    %28 = vector.extract_strided_slice %27 {offsets = [0, 0, 0, 0], sizes = [2, 1, 8, 8], strides = [1, 1, 1, 1]} : vector<2x4x8x8xf32> to vector<2x1x8x8xf32>
    %29 = vector.shape_cast %28 : vector<2x1x8x8xf32> to vector<2x8x8xf32>
    %30 = vector.extract_strided_slice %27 {offsets = [0, 1, 0, 0], sizes = [2, 1, 8, 8], strides = [1, 1, 1, 1]} : vector<2x4x8x8xf32> to vector<2x1x8x8xf32>
    %31 = vector.shape_cast %30 : vector<2x1x8x8xf32> to vector<2x8x8xf32>
    %32 = vector.extract_strided_slice %27 {offsets = [0, 2, 0, 0], sizes = [2, 1, 8, 8], strides = [1, 1, 1, 1]} : vector<2x4x8x8xf32> to vector<2x1x8x8xf32>
    %33 = vector.shape_cast %32 : vector<2x1x8x8xf32> to vector<2x8x8xf32>
    %34 = vector.extract_strided_slice %27 {offsets = [0, 3, 0, 0], sizes = [2, 1, 8, 8], strides = [1, 1, 1, 1]} : vector<2x4x8x8xf32> to vector<2x1x8x8xf32>
    %35 = vector.shape_cast %34 : vector<2x1x8x8xf32> to vector<2x8x8xf32>
    %36 = tpu.concatenate %29, %31, %33, %35 in 2 : vector<2x8x8xf32>, vector<2x8x8xf32>, vector<2x8x8xf32>, vector<2x8x8xf32> -> vector<2x8x32xf32>
    %37 = vector.shape_cast %36 : vector<2x8x32xf32> to vector<16x32xf32>
    %38 = arith.truncf %37 : vector<16x32xf32> to vector<16x32xbf16>
    %c0_18 = arith.constant 0 : index
    %c0_19 = arith.constant 0 : index
    %39 = vector.load %arg5[%c0_18, %c0_19] : memref<32x32xbf16, #tpu.memory_space<vmem>>, vector<32x32xbf16>
    %cst_20 = arith.constant dense<0.000000e+00> : vector<16x32xf32>
    %40 = tpu.matmul %38, %39, %cst_20 {dimension_numbers = #tpu.dot_dimension_numbers<[1], [0], [0], [1], [0, 0, 1, 1], [], []>} : vector<16x32xbf16>, vector<32x32xbf16>, vector<16x32xf32> -> vector<16x32xf32>
    %c0_21 = arith.constant 0 : index
    %c0_22 = arith.constant 0 : index
    %41 = vector.load %arg6[%c0_21, %c0_22] : memref<1x32xf32, #tpu.memory_space<vmem>>, vector<1x32xf32>
    %42 = vector.broadcast %41 : vector<1x32xf32> to vector<16x32xf32>
    %43 = arith.addf %40, %42 : vector<16x32xf32>
    %44 = vector.shape_cast %43 : vector<16x32xf32> to vector<2x8x32xf32>
    %c0_23 = arith.constant 0 : index
    %c0_24 = arith.constant 0 : index
    %c0_25 = arith.constant 0 : index
    %45 = vector.load %arg7[%c0_23, %c0_24, %c0_25] : memref<2x8x32xf32, #tpu.memory_space<vmem>>, vector<2x8x32xf32>
    tpu.vector_store %arg7[%c0_23, %c0_24, %c0_25], %44 {strides = array<i32>} : memref<2x8x32xf32, #tpu.memory_space<vmem>>, vector<2x8x32xf32>,
    return
  }
  func.func @transform_0(%arg0: i32, %arg1: i32) -> (i32, i32) {
    %c0_i32 = arith.constant 0 : i32
    %c0_i32_0 = arith.constant 0 : i32
    return %arg0, %c0_i32 : i32, i32
  }
  func.func @transform_1(%arg0: i32, %arg1: i32) -> (i32, i32) {
    %c0_i32 = arith.constant 0 : i32
    %c0_i32_0 = arith.constant 0 : i32
    %c0_i32_1 = arith.constant 0 : i32
    return %c0_i32, %c0_i32_0 : i32, i32
  }
  func.func @transform_2(%arg0: i32, %arg1: i32) -> (i32, i32) {
    %c0_i32 = arith.constant 0 : i32
    %c0_i32_0 = arith.constant 0 : i32
    %c0_i32_1 = arith.constant 0 : i32
    return %c0_i32, %c0_i32_0 : i32, i32
  }
  func.func @transform_3(%arg0: i32, %arg1: i32) -> (i32, i32) {
    %c0_i32 = arith.constant 0 : i32
    %c0_i32_0 = arith.constant 0 : i32
    %c0_i32_1 = arith.constant 0 : i32
    return %c0_i32, %c0_i32_0 : i32, i32
  }
  func.func @transform_4(%arg0: i32, %arg1: i32) -> (i32, i32) {
    %c0_i32 = arith.constant 0 : i32
    %c0_i32_0 = arith.constant 0 : i32
    %c0_i32_1 = arith.constant 0 : i32
    return %c0_i32, %c0_i32_0 : i32, i32
  }
  func.func @transform_5(%arg0: i32, %arg1: i32) -> (i32, i32, i32) {
    %c0_i32 = arith.constant 0 : i32
    %c0_i32_0 = arith.constant 0 : i32
    return %arg0, %arg1, %c0_i32 : i32, i32, i32
  }
  func.func @transform_6(%arg0: i32, %arg1: i32) -> (i32, i32, i32, i32) {
    %c0_i32 = arith.constant 0 : i32
    %c0_i32_0 = arith.constant 0 : i32
    %c0_i32_1 = arith.constant 0 : i32
    return %arg0, %c0_i32, %arg1, %c0_i32_0 : i32, i32, i32, i32
  }
}

</mosaic_0001>

<bundles_post_ra>
// kernel: tpu_custom_call.1
= control target key start
LH: loop header
LB: loop body
LE: loop exit
PB: predicated region body
PF: predicated region fallthrough
CT: control target
= control target key end

     0   :  { %12 = vsyncpa [#allocation6], 0  ;;  %s1274_s0 = inlined_call_operand.hbm [shape: bf16[16,32], index: 0, kind: input, shape index: {}]   ;;  %s1275_s1 = inlined_call_operand.hbm [shape: bf16[32,96], index: 1, kind: input, shape index: {}]   ;;  %s1276_s2 = inlined_call_operand.vmem [shape: f32[1,96], index: 2, kind: input, shape index: {}]   ;;  %s1277_s3 = inlined_call_operand.hbm [shape: bf16[32,32], index: 3, kind: input, shape index: {}]   ;;  %s1278_s4 = inlined_call_operand.vmem [shape: f32[1,32], index: 4, kind: input, shape index: {}]   ;;  %s1279_s5 = inlined_call_operand.hbm [shape: f32[2,8,32], index: 5, kind: output, shape index: {0}]   ;;  %s1280_s6 = inlined_call_operand.hbm [shape: f32[2,4,8,8], index: 6, kind: output, shape index: {1}]  }
   0x1   :  { %13 = vsyncpa [#allocation9], 0 }
   0x2   :  { %14 = vsyncpa [#allocation7], 0 }
   0x3   :  { %15 = vsyncpa [#allocation13], 0  ;;  %s33_s23 = sshll.u32 %s1275_s1, 4  ;;  %s1018_s24 = smov [#allocation8]   ;;  %s34_s23 = int_to_ptr.hbm [resolvable:$true] %s33_s23 }
   0x4   :  { %s35_s25 = sshll.u32 %s1018_s24, 4  ;;  %s20_s28 = sshll.u32 %s1274_s0, 4  ;;  %s36_s25 = int_to_ptr.vmem [resolvable:$true] %s35_s25  ;;  %s21_s28 = int_to_ptr.hbm [resolvable:$true] %s20_s28 }
   0x5   :  { %s1019_s29 = smov 64   ;;  %s1020_s30 = smov 4  }
   0x6   :  { %41 = dma.hbm_to_vmem [thread:$0]  %s34_s23, 256, %s36_s25, [#allocation9], %s1019_s29, %s1019_s29, %s1020_s30  }
   0x7   :  { %s1021_s7 = smov [#allocation5]   ;;  %s48_s1 = sshll.u32 %s1277_s3, 4  ;;  %s49_s1 = int_to_ptr.hbm [resolvable:$true] %s48_s1 }
   0x8   :  { %s22_s8 = sshll.u32 %s1021_s7, 4  ;;  %s1022_s11 = smov [#allocation10]   ;;  %s23_s8 = int_to_ptr.vmem [resolvable:$true] %s22_s8 }
   0x9   :  { %28 = dma.hbm_to_vmem [thread:$0]  %s21_s28, 128, %s23_s8, [#allocation6], %s1019_s29, %s1019_s29, %s1020_s30  }
   0xa   :  { %s50_s12 = sshll.u32 %s1022_s11, 4  ;;  %s51_s12 = int_to_ptr.vmem [resolvable:$true] %s50_s12 }
   0xb   :  { %56 = dma.hbm_to_vmem [thread:$0]  %s49_s1, 256, %s51_s12, [#allocation9], %s1019_s29, %s1019_s29, %s1020_s30  }
   0xc   :  { %1010 = dma.done.wait [#allocation6], 128  }
   0xd   :  { %1011 = vsyncadd [#allocation6], 4294967168 }
   0xe   :  { %1012 = dma.done.wait [#allocation9], 512  }
   0xf   :  { %1013 = vsyncadd [#allocation9], 4294966784  ;;  %v817_v0 = vld [vmem:[#allocation8 + $0x8] sm:$0xff]  ;;  %v816_v1 = vld [vmem:[#allocation8] sm:$0xff]  ;;  %vm103_vm0 = vcmask 261120   ;;  %vm123_vm1 = vcmask 60416  }
  0x10   :  { %113 = vmatpush.bf16.msra.mxu0 %v817_v0  ;;  %v815_v2 = vld [vmem:[#allocation5] sm:$0xff]  ;;  %s1023_s13 = smov 72   ;;  %s1024_s14 = smov 120   ;;  %vm254_vm2 = vcmask 64512   ;;  %vm514_vm3 = vcmask 1043456   ;;  %vm690_vm4 = vcmask 130048  }
  0x11   :  { %v856_v3 = vld [vmem:[%s1276_s2] ss:$0 sm:$0xff]  ;;  %s1025_s15 = smov 88   ;;  %s1026_s2 = smov 112   ;;  %vm693_vm5 = vcmask 195584  }
  0x12   :  { %s1027_s16 = smov 80   ;;  %s1028_s17 = smov 104  }
  0x13   :  { %s1029_s18 = smov 96   ;;  %s1030_s19 = smov 40  }
  0x14   :  { %114 = vmatpush.bf16.msra.mxu0 %v816_v1  ;;  %s1031_s20 = smov 56   ;;  %s1032_s21 = smov 48  }
  0x15   :  { %s1033_s22 = smov 16   ;;  %s1034_s23 = smov 8  }
  0x16   :  { %s1035_s24 = smov 24   ;;  %s1036_s25 = smov [#allocation12]  }
  0x17   :  { %789 = vmatmul.msk.bf16.vlgmr.msra.gmra.mxu0 %vm103_vm0, %v815_v2  ;;  %s754_s26 = sshll.u32 %s1036_s25, 4  ;;  %s1037_s30 = smov 128   ;;  %s755_s26 = int_to_ptr.vmem [resolvable:$true] %s754_s26 }
  0x18   :  { %s1038_s9 = smov [#allocation11]   ;;  %s743_s12 = sshll.u32 %s1279_s5, 4  ;;  %s744_s12 = int_to_ptr.hbm [resolvable:$true] %s743_s12 }
  0x19   :  { %s741_s10 = sshll.u32 %s1038_s9, 4  ;;  %s742_s10 = int_to_ptr.vmem [resolvable:$true] %s741_s10 }
  0x94   :  { %v116_v4 = vpop.f32.mrf.mxu0 }
  0x95   :  { %v117_v5 = vadd.f32 %v856_v3, %v116_v4 }
  0x97   :  { %v1093_v6 = vpack.c.bf16 %v117_v5, %v117_v5 }
  0x99   :  { %207 = vrot.lane.b32.xlu2 %v1093_v6, %s1023_s13  ;;  %144 = vrot.lane.b32.xlu1 %v1093_v6, %s1024_s14  ;;  %124 = vst.msk [vmem:[#allocation2] sm:$0xf] %vm123_vm1, %v1093_v6 }
  0x9a   :  { %153 = vrot.lane.b32.xlu0 %v1093_v6, %s1025_s15 }
  0x9c   :  { %v118_v7 = vpop.f32.mrf.mxu0 }
  0x9d   :  { %v119_v8 = vadd.f32 %v856_v3, %v118_v7 }
  0x9f   :  { %v1100_v9 = vpack.c.bf16 %v119_v8, %v119_v8 }
  0xa0   :  { %v230_v46 = vld [vmem:[#allocation2] sm:$0xf] }
  0xa1   :  { %155 = vrot.lane.b32.xlu2 %v1100_v9, %s1025_s15  ;;  %171 = vrot.lane.b32.xlu1 %v1093_v6, %s1026_s2  ;;  %125 = vst.msk [vmem:[#allocation2 + $0x10] sm:$0xf] %vm123_vm1, %v1100_v9 }
  0xa2   :  { %180 = vrot.lane.b32.xlu0 %v1093_v6, %s1027_s16 }
  0xa8   :  { %v234_v47 = vld [vmem:[#allocation2 + $0x10] sm:$0xf] }
  0xa9   :  { %146 = vrot.lane.b32.xlu2 %v1100_v9, %s1024_s14  ;;  %198 = vrot.lane.b32.xlu1 %v1093_v6, %s1028_s17 }
  0xaa   :  { %182 = vrot.lane.b32.xlu0 %v1100_v9, %s1027_s16 }
  0xb1   :  { %200 = vrot.lane.b32.xlu2 %v1100_v9, %s1028_s17  ;;  %209 = vrot.lane.b32.xlu1 %v1100_v9, %s1023_s13 }
  0xb2   :  { %173 = vrot.lane.b32.xlu0 %v1100_v9, %s1026_s2 }
  0xb9   :  { %130 = vrot.lane.b32.xlu1 %v1100_v9, %s1029_s18 }
  0xba   :  { %128 = vrot.lane.b32.xlu0 %v1093_v6, %s1029_s18 }
  0xf3   :  { %v208_v10 = vpop.permute.xlu2 %207 }
  0xf4   :  { %214 = vst.msk [vmem:[#allocation3 + $0xc] sm:$0xf] %vm123_vm1, %v208_v10 }
  0xfb   :  { %v156_v11 = vpop.permute.xlu2 %155  ;;  %v241_v12 = vld [vmem:[#allocation3 + $0xc] sm:$0xf] }
  0xfc   :  { %161 = vst.msk [vmem:[#allocation3 + $0x14] sm:$0xf] %vm123_vm1, %v156_v11  ;;  %v316_v13 = vsel %vm254_vm2, %v241_v12, 0 }
  0xfd   :  { %325 = vmatpush.bf16.xpose.msrb.mxu0 %v316_v13 }
 0x103   :  { %v147_v14 = vpop.permute.xlu2 %146  ;;  %v243_v20 = vld [vmem:[#allocation3 + $0x14] sm:$0xf] }
 0x104   :  { %152 = vst.msk [vmem:[#allocation2 + $0x14] sm:$0xf] %vm123_vm1, %v147_v14  ;;  %v354_v23 = vsel %vm254_vm2, %v243_v20, 0 }
 0x10b   :  { %v201_v15 = vpop.permute.xlu2 %200  ;;  %v145_v16 = vpop.permute.xlu1 %144  ;;  %v235_v39 = vld [vmem:[#allocation2 + $0x14] sm:$0xf] }
 0x10c   :  { %206 = vst.msk [vmem:[#allocation2 + $0x1c] sm:$0xf] %vm123_vm1, %v201_v15  ;;  %v154_v17 = vpop.permute.xlu0 %153 }
 0x10d   :  { %151 = vst.msk [vmem:[#allocation2 + $0x4] sm:$0xf] %vm123_vm1, %v145_v16 }
 0x10e   :  { %160 = vst.msk [vmem:[#allocation3 + $0x4] sm:$0xf] %vm123_vm1, %v154_v17 }
 0x113   :  { %v172_v18 = vpop.permute.xlu1 %171  ;;  %v237_v40 = vld [vmem:[#allocation2 + $0x1c] sm:$0xf] }
 0x114   :  { %178 = vst.msk [vmem:[#allocation2 + $0x8] sm:$0xf] %vm123_vm1, %v172_v18  ;;  %v181_v19 = vpop.permute.xlu0 %180  ;;  %v231_v27 = vld [vmem:[#allocation2 + $0x4] sm:$0xf] }
 0x115   :  { %187 = vst.msk [vmem:[#allocation3 + $0x8] sm:$0xf] %vm123_vm1, %v181_v19  ;;  %v239_v21 = vld [vmem:[#allocation3 + $0x4] sm:$0xf] }
 0x116   :  { %v278_v22 = vsel %vm254_vm2, %v239_v21, 0 }
 0x117   :  { %287 = vmatpush.bf16.xpose.msra.mxu2 %v278_v22 }
 0x11b   :  { %v199_v24 = vpop.permute.xlu1 %198  ;;  %v232_v32 = vld [vmem:[#allocation2 + $0x8] sm:$0xf] }
 0x11c   :  { %205 = vst.msk [vmem:[#allocation2 + $0xc] sm:$0xf] %vm123_vm1, %v199_v24  ;;  %v183_v25 = vpop.permute.xlu0 %182  ;;  %v240_v26 = vld [vmem:[#allocation3 + $0x8] sm:$0xf] }
 0x11d   :  { %188 = vst.msk [vmem:[#allocation3 + $0x18] sm:$0xf] %vm123_vm1, %v183_v25  ;;  %v297_v28 = vsel %vm254_vm2, %v240_v26, 0 }
 0x11e   :  { %791 = vmatmul.msk.bf16.vlgmr.msra.gmra.mxu2 %vm254_vm2, %v231_v27  ;;  %306 = vmatpush.bf16.xpose.msra.mxu3 %v297_v28 }
 0x11f   :  { %363 = vmatpush.bf16.xpose.msrb.mxu2 %v354_v23 }
 0x123   :  { %v210_v29 = vpop.permute.xlu1 %209  ;;  %v233_v30 = vld [vmem:[#allocation2 + $0xc] sm:$0xf] }
 0x124   :  { %215 = vst.msk [vmem:[#allocation3 + $0x1c] sm:$0xf] %vm123_vm1, %v210_v29  ;;  %v174_v31 = vpop.permute.xlu0 %173  ;;  %793 = vmatmul.msk.bf16.vlgmr.msrb.gmra.mxu0 %vm254_vm2, %v233_v30  ;;  %v244_v33 = vld [vmem:[#allocation3 + $0x18] sm:$0xf] }
 0x125   :  { %179 = vst.msk [vmem:[#allocation2 + $0x18] sm:$0xf] %vm123_vm1, %v174_v31  ;;  %792 = vmatmul.msk.bf16.vlgmr.msra.gmra.mxu3 %vm254_vm2, %v232_v32  ;;  %v373_v34 = vsel %vm254_vm2, %v244_v33, 0 }
 0x126   :  { %382 = vmatpush.bf16.xpose.msrb.mxu3 %v373_v34 }
 0x12b   :  { %v131_v35 = vpop.permute.xlu1 %130  ;;  %v245_v36 = vld [vmem:[#allocation3 + $0x1c] sm:$0xf] }
 0x12c   :  { %135 = vst.msk [vmem:[#allocation3 + $0x10] sm:$0xf] %vm123_vm1, %v131_v35  ;;  %v129_v37 = vpop.permute.xlu0 %128  ;;  %v392_v38 = vsel %vm254_vm2, %v245_v36, 0  ;;  %v236_v42 = vld [vmem:[#allocation2 + $0x18] sm:$0xf] }
 0x12d   :  { %134 = vst.msk [vmem:[#allocation3] sm:$0xf] %vm123_vm1, %v129_v37  ;;  %401 = vmatpush.bf16.xpose.msra.mxu0 %v392_v38 }
 0x12e   :  { %795 = vmatmul.msk.bf16.vlgmr.msrb.gmra.mxu2 %vm254_vm2, %v235_v39 }
 0x133   :  { %v242_v41 = vld [vmem:[#allocation3 + $0x10] sm:$0xf] }
 0x134   :  { %797 = vmatmul.msk.bf16.vlgmr.msra.gmra.mxu0 %vm254_vm2, %v237_v40  ;;  %v238_v43 = vld [vmem:[#allocation3] sm:$0xf]  ;;  %v335_v44 = vsel %vm254_vm2, %v242_v41, 0 }
 0x135   :  { %796 = vmatmul.msk.bf16.vlgmr.msrb.gmra.mxu3 %vm254_vm2, %v236_v42  ;;  %v259_v45 = vsel %vm254_vm2, %v238_v43, 0 }
 0x136   :  { %268 = vmatpush.bf16.xpose.msra.mxu1 %v259_v45 }
 0x13d   :  { %790 = vmatmul.msk.bf16.vlgmr.msra.gmra.mxu1 %vm254_vm2, %v230_v46 }
 0x13e   :  { %344 = vmatpush.bf16.xpose.msrb.mxu1 %v335_v44 }
 0x14d   :  { %794 = vmatmul.msk.bf16.vlgmr.msrb.gmra.mxu1 %vm254_vm2, %v234_v47 }
 0x1a1   :  { %v289_v48 = vpop.f32.mrf.mxu2  ;;  %v327_v49 = vpop.f32.mrf.mxu0 }
 0x1a2   :  { %v410_v50 = vsel %vm254_vm2, %v289_v48, -inf  ;;  %v416_v51 = vsel %vm254_vm2, %v327_v49, -inf }
 0x1a3   :  { %411 = vmax.xlane.f32.xlu2 %v410_v50  ;;  %417 = vmax.xlane.f32.xlu1 %v416_v51 }
 0x1a8   :  { %v308_v52 = vpop.f32.mrf.mxu3 }
 0x1a9   :  { %v291_v53 = vpop.f32.mrf.mxu2  ;;  %v329_v54 = vpop.f32.mrf.mxu0  ;;  %v413_v55 = vsel %vm254_vm2, %v308_v52, -inf }
 0x1aa   :  { %414 = vmax.xlane.f32.xlu0 %v413_v55 }
 0x1b0   :  { %v310_v56 = vpop.f32.mrf.mxu3 }
 0x1b1   :  { %v1148_v57 = vpop.f32.mrf.mxu2  ;;  %v1150_v58 = vpop.f32.mrf.mxu0 }
 0x1b2   :  { %v422_v59 = vsel %vm254_vm2, %v1148_v57, -inf  ;;  %v428_v60 = vsel %vm254_vm2, %v1150_v58, -inf }
 0x1b3   :  { %423 = vmax.xlane.f32.xlu2 %v422_v59  ;;  %429 = vmax.xlane.f32.xlu0 %v428_v60 }
 0x1b8   :  { %v384_v61 = vpop.f32.mrf.mxu3 }
 0x1b9   :  { %v367_v62 = vpop.f32.mrf.mxu2  ;;  %v405_v63 = vpop.f32.mrf.mxu0  ;;  %v425_v0 = vsel %vm254_vm2, %v384_v61, -inf }
 0x1ba   :  { %v1157_v1 = vpop.f32.mrf.mxu1 }
 0x1bb   :  { %426 = vmax.xlane.f32.xlu2 %v425_v0  ;;  %v407_v2 = vsel %vm254_vm2, %v1157_v1, -inf }
 0x1bc   :  { %408 = vmax.xlane.f32.xlu1 %v407_v2 }
 0x1c0   :  { %v386_v3 = vpop.f32.mrf.mxu3 }
 0x1c2   :  { %v272_v4 = vpop.f32.mrf.mxu1 }
 0x1c7   :  { %216 = vrot.lane.b32.xlu0 %v1093_v6, %s1030_s19 }
 0x1ca   :  { %v1163_v5 = vpop.f32.mrf.mxu1 }
 0x1cb   :  { %v419_v8 = vsel %vm254_vm2, %v1163_v5, -inf }
 0x1d2   :  { %v348_v7 = vpop.f32.mrf.mxu1 }
 0x1d3   :  { %162 = vrot.lane.b32.xlu2 %v1093_v6, %s1031_s20 }
 0x1d5   :  { %189 = vrot.lane.b32.xlu1 %v1093_v6, %s1032_s21 }
 0x1ff   :  { %420 = vmax.xlane.f32.xlu1 %v419_v8 }
 0x216   :  { %v412_v10 = vpop.xlane.xlu2 %411  ;;  %v418_v11 = vpop.xlane.xlu1 %417 }
 0x217   :  { %v432_v12 = vsub.f32 %v289_v48, %v412_v10  ;;  %v434_v13 = vsub.f32 %v327_v49, %v418_v11 }
 0x219   :  { %v441_v14 = vmul.f32 1.442695, %v432_v12  ;;  %v445_v15 = vmul.f32 1.442695, %v434_v13 }
 0x21b   :  { %858 = vpow2.f32 %v441_v14 }
 0x21c   :  { %860 = vpow2.f32 %v445_v15 }
 0x21d   :  { %v415_v16 = vpop.xlane.xlu0 %414 }
 0x21e   :  { %v433_v17 = vsub.f32 %v308_v52, %v415_v16 }
 0x220   :  { %v443_v18 = vmul.f32 1.442695, %v433_v17 }
 0x221   :  { %v1171_v19 = vpop.eup %858 }
 0x222   :  { %v1173_v20 = vpop.eup %860  ;;  %862 = vpow2.f32 %v443_v18  ;;  %v458_v21 = vsel %vm254_vm2, %v1171_v19, 0.0 }
 0x223   :  { %459 = vadd.xlane.f32.xlu0 %v458_v21  ;;  %v464_v22 = vsel %vm254_vm2, %v1173_v20, 0.0 }
 0x224   :  { %465 = vadd.xlane.f32.xlu2 %v464_v22 }
 0x226   :  { %v424_v23 = vpop.xlane.xlu2 %423  ;;  %v430_v28 = vpop.xlane.xlu0 %429 }
 0x227   :  { %v436_v42 = vsub.f32 %v1148_v57, %v424_v23  ;;  %v438_v44 = vsub.f32 %v1150_v58, %v430_v28 }
 0x228   :  { %v1179_v24 = vpop.eup %862 }
 0x229   :  { %v461_v25 = vsel %vm254_vm2, %v1179_v24, 0.0  ;;  %v449_v43 = vmul.f32 1.442695, %v436_v42 }
 0x22b   :  { %462 = vadd.xlane.f32.xlu0 %v461_v25 }
 0x22e   :  { %v427_v26 = vpop.xlane.xlu2 %426 }
 0x22f   :  { %v437_v27 = vsub.f32 %v384_v61, %v427_v26  ;;  %v409_v35 = vpop.xlane.xlu1 %408 }
 0x230   :  { %v431_v46 = vsub.f32 %v1157_v1, %v409_v35 }
 0x231   :  { %v451_v29 = vmul.f32 1.442695, %v437_v27 }
 0x232   :  { %v439_v48 = vmul.f32 1.442695, %v431_v46 }
 0x233   :  { %864 = vpow2.f32 %v451_v29 }
 0x234   :  { %866 = vpow2.f32 %v449_v43 }
 0x236   :  { %v163_v30 = vpop.permute.xlu2 %162 }
 0x237   :  { %169 = vst.msk [vmem:[#allocation4 + $0x4] sm:$0xf] %vm123_vm1, %v163_v30 }
 0x239   :  { %v1184_v31 = vpop.eup %864  ;;  %v217_v32 = vpop.permute.xlu0 %216 }
 0x23a   :  { %223 = vst.msk [vmem:[#allocation4 + $0xc] sm:$0xf] %vm123_vm1, %v217_v32  ;;  %v473_v33 = vsel %vm254_vm2, %v1184_v31, 0.0  ;;  %v1205_v45 = vpop.eup %866 }
 0x23b   :  { %474 = vadd.xlane.f32.xlu1 %v473_v33  ;;  %v470_v47 = vsel %vm254_vm2, %v1205_v45, 0.0 }
 0x23c   :  { %191 = vrot.lane.b32.xlu2 %v1100_v9, %s1032_s21 }
 0x23e   :  { %v247_v34 = vld [vmem:[#allocation4 + $0x4] sm:$0xf] }
 0x23f   :  { %164 = vrot.lane.b32.xlu0 %v1100_v9, %s1031_s20  ;;  %v535_v36 = vsel %vm514_vm3, %v247_v34, 0 }
 0x240   :  { %544 = vmatpush.bf16.msra.mxu2 %v535_v36 }
 0x241   :  { %v249_v37 = vld [vmem:[#allocation4 + $0xc] sm:$0xf] }
 0x242   :  { %v573_v38 = vsel %vm514_vm3, %v249_v37, 0 }
 0x243   :  { %582 = vmatpush.bf16.msrb.mxu0 %v573_v38 }
 0x244   :  { %136 = vrot.lane.b32.xlu2 %v1093_v6, %s1019_s29  ;;  %v453_v6 = vmul.f32 1.442695, %v438_v44 }
 0x246   :  { %868 = vpow2.f32 %v453_v6 }
 0x247   :  { %v190_v39 = vpop.permute.xlu1 %189  ;;  %870 = vpow2.f32 %v439_v48 }
 0x248   :  { %196 = vst.msk [vmem:[#allocation4 + $0x8] sm:$0xf] %vm123_vm1, %v190_v39 }
 0x24c   :  { %138 = vrot.lane.b32.xlu2 %v1100_v9, %s1019_s29  ;;  %v1210_v49 = vpop.eup %868  ;;  %s756_s29 = sshll.u32 %s1280_s6, 4  ;;  %s757_s29 = int_to_ptr.hbm [resolvable:$true] %s756_s29 }
 0x24d   :  { %v1215_v52 = vpop.eup %870 }
 0x24e   :  { %v455_v54 = vsel %vm254_vm2, %v1215_v52, 0.0 }
 0x24f   :  { %v248_v40 = vld [vmem:[#allocation4 + $0x8] sm:$0xf] }
 0x250   :  { %v554_v41 = vsel %vm514_vm3, %v248_v40, 0 }
 0x251   :  { %563 = vmatpush.bf16.msra.mxu3 %v554_v41 }
 0x254   :  { %218 = vrot.lane.b32.xlu1 %v1100_v9, %s1030_s19  ;;  %v476_v9 = vsel %vm254_vm2, %v1210_v49, 0.0 }
 0x269   :  { %471 = vadd.xlane.f32.xlu0 %v470_v47 }
 0x271   :  { %477 = vadd.xlane.f32.xlu0 %v476_v9 }
 0x272   :  { %v421_v50 = vpop.xlane.xlu1 %420 }
 0x273   :  { %v435_v51 = vsub.f32 %v1163_v5, %v421_v50 }
 0x275   :  { %v447_v53 = vmul.f32 1.442695, %v435_v51 }
 0x277   :  { %872 = vpow2.f32 %v447_v53 }
 0x279   :  { %456 = vadd.xlane.f32.xlu0 %v455_v54 }
 0x27d   :  { %v1219_v55 = vpop.eup %872 }
 0x27e   :  { %v467_v56 = vsel %vm254_vm2, %v1219_v55, 0.0 }
 0x27f   :  { %468 = vadd.xlane.f32.xlu1 %v467_v56 }
 0x296   :  { %v460_v57 = vpop.xlane.xlu0 %459 }
 0x297   :  { %874 = vrcp.f32 %v460_v57  ;;  %v466_v58 = vpop.xlane.xlu2 %465 }
 0x298   :  { %876 = vrcp.f32 %v466_v58 }
 0x29d   :  { %v875_v59 = vpop.eup %874 }
 0x29e   :  { %v877_v60 = vpop.eup %876  ;;  %v488_v61 = vmul.f32 %v875_v59, %v1171_v19  ;;  %v463_v62 = vpop.xlane.xlu0 %462  ;;  %v819_v59 = vld [vmem:[#allocation10 + $0x8] sm:$0xff] }
 0x29f   :  { %v490_v63 = vmul.f32 %v877_v60, %v1173_v20  ;;  %878 = vrcp.f32 %v463_v62  ;;  %v192_v0 = vpop.permute.xlu2 %191  ;;  %v818_v60 = vld [vmem:[#allocation10] sm:$0xff] }
 0x2a0   :  { %496 = vst.msk [vmem:[#allocation12 + $0x8] sm:$0xff] %vm254_vm2, %v488_v61  ;;  %v504_v1 = vpack.c.bf16 %v488_v61, %v488_v61 }
 0x2a1   :  { %498 = vst.msk [vmem:[#allocation12 + $0x18] sm:$0xff] %vm254_vm2, %v490_v63  ;;  %v506_v2 = vpack.c.bf16 %v490_v63, %v490_v63 }
 0x2a2   :  { %197 = vst.msk [vmem:[#allocation4 + $0x18] sm:$0xf] %vm123_vm1, %v192_v0  ;;  %799 = vmatmul.msk.bf16.vlgmr.msra.gmra.mxu2 %vm254_vm2, %v504_v1 }
 0x2a3   :  { %801 = vmatmul.msk.bf16.vlgmr.msrb.gmra.mxu0 %vm254_vm2, %v506_v2 }
 0x2a5   :  { %v879_v3 = vpop.eup %878 }
 0x2a6   :  { %v489_v4 = vmul.f32 %v879_v3, %v1179_v24 }
 0x2a7   :  { %v137_v5 = vpop.permute.xlu2 %136 }
 0x2a8   :  { %497 = vst.msk [vmem:[#allocation12 + $0x10] sm:$0xff] %vm254_vm2, %v489_v4  ;;  %v505_v7 = vpack.c.bf16 %v489_v4, %v489_v4 }
 0x2a9   :  { %142 = vst.msk [vmem:[#allocation4] sm:$0xf] %vm123_vm1, %v137_v5  ;;  %v252_v8 = vld [vmem:[#allocation4 + $0x18] sm:$0xf] }
 0x2aa   :  { %800 = vmatmul.msk.bf16.vlgmr.msra.gmra.mxu3 %vm254_vm2, %v505_v7  ;;  %v630_v10 = vsel %vm514_vm3, %v252_v8, 0 }
 0x2ab   :  { %639 = vmatpush.bf16.msrb.mxu3 %v630_v10 }
 0x2ae   :  { %v475_v11 = vpop.xlane.xlu1 %474 }
 0x2af   :  { %880 = vrcp.f32 %v475_v11  ;;  %v139_v12 = vpop.permute.xlu2 %138 }
 0x2b0   :  { %143 = vst.msk [vmem:[#allocation4 + $0x10] sm:$0xf] %vm123_vm1, %v139_v12  ;;  %v246_v13 = vld [vmem:[#allocation4] sm:$0xf] }
 0x2b1   :  { %v165_v14 = vpop.permute.xlu0 %164  ;;  %v516_v15 = vsel %vm514_vm3, %v246_v13, 0 }
 0x2b2   :  { %170 = vst.msk [vmem:[#allocation4 + $0x14] sm:$0xf] %vm123_vm1, %v165_v14  ;;  %525 = vmatpush.bf16.msra.mxu1 %v516_v15  ;;  %v857_v15 = vld [vmem:[%s1278_s4] ss:$0 sm:$0xff] }
 0x2b5   :  { %v881_v16 = vpop.eup %880 }
 0x2b6   :  { %v493_v17 = vmul.f32 %v881_v16, %v1184_v31 }
 0x2b7   :  { %v250_v18 = vld [vmem:[#allocation4 + $0x10] sm:$0xf] }
 0x2b8   :  { %501 = vst.msk [vmem:[#allocation12 + $0x30] sm:$0xff] %vm254_vm2, %v493_v17  ;;  %v509_v19 = vpack.c.bf16 %v493_v17, %v493_v17  ;;  %v592_v20 = vsel %vm514_vm3, %v250_v18, 0 }
 0x2b9   :  { %601 = vmatpush.bf16.msrb.mxu1 %v592_v20  ;;  %v251_v21 = vld [vmem:[#allocation4 + $0x14] sm:$0xf] }
 0x2ba   :  { %804 = vmatmul.msk.bf16.vlgmr.msrb.gmra.mxu3 %vm254_vm2, %v509_v19  ;;  %v611_v22 = vsel %vm514_vm3, %v251_v21, 0 }
 0x2bb   :  { %620 = vmatpush.bf16.msrb.mxu2 %v611_v22 }
 0x2c6   :  { %v219_v23 = vpop.permute.xlu1 %218 }
 0x2c7   :  { %224 = vst.msk [vmem:[#allocation4 + $0x1c] sm:$0xf] %vm123_vm1, %v219_v23 }
 0x2ce   :  { %v253_v24 = vld [vmem:[#allocation4 + $0x1c] sm:$0xf] }
 0x2cf   :  { %v649_v25 = vsel %vm514_vm3, %v253_v24, 0 }
 0x2d0   :  { %658 = vmatpush.bf16.msra.mxu0 %v649_v25 }
 0x2dc   :  { %v472_v26 = vpop.xlane.xlu0 %471 }
 0x2dd   :  { %882 = vrcp.f32 %v472_v26 }
 0x2e3   :  { %v883_v27 = vpop.eup %882 }
 0x2e4   :  { %v492_v28 = vmul.f32 %v883_v27, %v1205_v45  ;;  %v478_v29 = vpop.xlane.xlu0 %477 }
 0x2e5   :  { %884 = vrcp.f32 %v478_v29 }
 0x2e6   :  { %500 = vst.msk [vmem:[#allocation12 + $0x28] sm:$0xff] %vm254_vm2, %v492_v28  ;;  %v508_v30 = vpack.c.bf16 %v492_v28, %v492_v28 }
 0x2e8   :  { %803 = vmatmul.msk.bf16.vlgmr.msrb.gmra.mxu2 %vm254_vm2, %v508_v30 }
 0x2eb   :  { %v885_v31 = vpop.eup %884 }
 0x2ec   :  { %v494_v32 = vmul.f32 %v885_v31, %v1210_v49  ;;  %v457_v33 = vpop.xlane.xlu0 %456 }
 0x2ed   :  { %886 = vrcp.f32 %v457_v33 }
 0x2ee   :  { %502 = vst.msk [vmem:[#allocation12 + $0x38] sm:$0xff] %vm254_vm2, %v494_v32  ;;  %v510_v34 = vpack.c.bf16 %v494_v32, %v494_v32 }
 0x2f0   :  { %805 = vmatmul.msk.bf16.vlgmr.msra.gmra.mxu0 %vm254_vm2, %v510_v34 }
 0x2f2   :  { %v469_v35 = vpop.xlane.xlu1 %468 }
 0x2f3   :  { %v887_v36 = vpop.eup %886  ;;  %888 = vrcp.f32 %v469_v35 }
 0x2f4   :  { %v487_v37 = vmul.f32 %v887_v36, %v1215_v52 }
 0x2f6   :  { %495 = vst.msk [vmem:[#allocation12] sm:$0xff] %vm254_vm2, %v487_v37  ;;  %v503_v38 = vpack.c.bf16 %v487_v37, %v487_v37 }
 0x2f8   :  { %798 = vmatmul.msk.bf16.vlgmr.msra.gmra.mxu1 %vm254_vm2, %v503_v38 }
 0x2f9   :  { %v889_v39 = vpop.eup %888  ;;  %727 = vmatpush.bf16.msra.mxu1 %v819_v59 }
 0x2fa   :  { %v491_v40 = vmul.f32 %v889_v39, %v1219_v55 }
 0x2fc   :  { %499 = vst.msk [vmem:[#allocation12 + $0x20] sm:$0xff] %vm254_vm2, %v491_v40  ;;  %v507_v41 = vpack.c.bf16 %v491_v40, %v491_v40 }
 0x2fd   :  { %728 = vmatpush.bf16.msra.mxu1 %v818_v60  ;;  %762 = dma.vmem_to_hbm [thread:$0]  %s755_s26, 1024, %s757_s29, [#allocation13], %s1037_s30, %s1037_s30, %s1034_s23  }
 0x308   :  { %802 = vmatmul.msk.bf16.vlgmr.msrb.gmra.mxu1 %vm254_vm2, %v507_v41 }
 0x320   :  { %v584_v42 = vpop.f32.mrf.mxu0 }
 0x325   :  { %v546_v43 = vpop.f32.mrf.mxu2 }
 0x328   :  { %v586_v44 = vpop.f32.mrf.mxu0 }
 0x32d   :  { %v548_v6 = vpop.f32.mrf.mxu2  ;;  %v565_v45 = vpop.f32.mrf.mxu3 }
 0x335   :  { %v567_v46 = vpop.f32.mrf.mxu3 }
 0x33d   :  { %v641_v47 = vpop.f32.mrf.mxu3 }
 0x33e   :  { %v846_v48 = vpack.i.bf16 %v641_v47, %v565_v45 }
 0x340   :  { %847 = vrot.lane.b32.xlu2 %v846_v48, %s1033_s22 }
 0x345   :  { %v643_v49 = vpop.f32.mrf.mxu3 }
 0x36b   :  { %v622_v9 = vpop.f32.mrf.mxu2 }
 0x36c   :  { %v841_v50 = vpack.i.bf16 %v622_v9, %v546_v43 }
 0x36d   :  { %v660_v51 = vpop.f32.mrf.mxu0 }
 0x36e   :  { %v851_v52 = vpack.i.bf16 %v660_v51, %v584_v42  ;;  %842 = vrot.lane.b32.xlu0 %v841_v50, %s1034_s23 }
 0x370   :  { %852 = vrot.lane.b32.xlu2 %v851_v52, %s1035_s24 }
 0x373   :  { %v624_v53 = vpop.f32.mrf.mxu2 }
 0x375   :  { %v527_v54 = vpop.f32.mrf.mxu1  ;;  %v662_v55 = vpop.f32.mrf.mxu0 }
 0x37d   :  { %v529_v56 = vpop.f32.mrf.mxu1 }
 0x385   :  { %v603_v57 = vpop.f32.mrf.mxu1 }
 0x38d   :  { %v605_v58 = vpop.f32.mrf.mxu1 }
 0x39a   :  { %v848_v61 = vpop.permute.xlu2 %847 }
 0x39b   :  { %v850_v2 = vunpack.i.h.bf16 %v848_v61  ;;  %v849_v3 = vunpack.i.l.bf16 %v848_v61 }
 0x3ca   :  { %v853_v62 = vpop.permute.xlu2 %852 }
 0x3cb   :  { %v855_v4 = vunpack.i.h.bf16 %v853_v62  ;;  %v854_v5 = vunpack.i.l.bf16 %v853_v62 }
 0x3e0   :  { %v843_v63 = vpop.permute.xlu0 %842 }
 0x3e1   :  { %v845_v0 = vunpack.i.h.bf16 %v843_v63  ;;  %v844_v1 = vunpack.i.l.bf16 %v843_v63 }
 0x3e3   :  { %v688_v7 = vsel %vm254_vm2, %v527_v54, %v844_v1  ;;  %v689_v8 = vsel %vm254_vm2, %v603_v57, %v845_v0 }
 0x3e4   :  { %v691_v10 = vsel %vm690_vm4, %v688_v7, %v849_v3  ;;  %v692_v11 = vsel %vm690_vm4, %v689_v8, %v850_v2 }
 0x3e5   :  { %v694_v12 = vsel %vm693_vm5, %v691_v10, %v854_v5  ;;  %v695_v13 = vsel %vm693_vm5, %v692_v11, %v855_v4 }
 0x3e6   :  { %v696_v14 = vpack.c.bf16 %v695_v13, %v694_v12 }
 0x3e8   :  { %814 = vmatmul.msk.bf16.vlgmr.msra.gmra.mxu1 %vm103_vm0, %v696_v14 }
 0x465   :  { %v730_v16 = vpop.f32.mrf.mxu1 }
 0x466   :  { %v731_v17 = vadd.f32 %v857_v15, %v730_v16 }
 0x468   :  { %735 = vst.msk [vmem:[#allocation11] sm:$0xff] %vm103_vm0, %v731_v17 }
 0x46d   :  { %v732_v18 = vpop.f32.mrf.mxu1 }
 0x46e   :  { %v733_v19 = vadd.f32 %v857_v15, %v732_v18 }
 0x470   :  { %736 = vst.msk [vmem:[#allocation11 + $0x8] sm:$0xff] %vm103_vm0, %v733_v19 }
 0x471   :  { %749 = dma.vmem_to_hbm [thread:$0]  %s742_s10, 256, %s744_s12, [#allocation7], %s1037_s30, %s1037_s30, %s1034_s23  }
 0x472   :  { %1014 = dma.done.wait [#allocation7], 256  }
 0x473   :  { %1015 = vsyncadd [#allocation7], 4294967040 }
 0x474   :  { %1016 = dma.done.wait [#allocation13], 1024  }
 0x475   :  { %1017 = vsyncadd [#allocation13], 4294966272 }
 0x476   :  { %771 = vsyncpa [#allocation6], 1 }
 0x477   :  { %772 = vsyncpa [#allocation9], 1 }
 0x478   :  { %773 = vsyncpa [#allocation7], 1 }
 0x479   :  { %774 = vsyncpa [#allocation13], 1 }

</bundles_post_ra>
